<compile_context>
chip_gen: v6e
topology: v6e:2x2x1
jax: 0.10.0
libtpu: 0.0.40
codegen_flags: <defaults>
</compile_context>

<pallas_src>
import functools

import jax
import jax.numpy as jnp
from jax import lax
from jax.experimental import pallas as pl
from jax.experimental.pallas import tpu as pltpu


def _vag_kernel(txt_ref, img_ref, wt_ref, wi_ref, bt_ref, bi_ref, loss_ref,
                *, margin: float, batch: int, pairs: int):
    """One grid step = `pairs` independent (txt, img) pairs.

    txt_ref:  (G*B, Dt)   txt contexts of G pairs stacked along sublanes
    img_ref:  (G*B, Di)   img contexts of G pairs stacked along sublanes
    wt_ref:   (Dt, O), wi_ref: (Di, O)      shared Linear weights (in, out)
    bt_ref:   (1, O),  bi_ref: (1, O)       shared Linear biases (broadcast in-kernel)
    loss_ref: (1, G)      per-pair mean max-margin contrastive loss (lane-dense)
    """
    gb = pairs * batch

    # Shared-space projections: two MXU matmuls on unpadded inputs + tanh (EUP).
    u = jnp.tanh(
        jnp.dot(txt_ref[...], wt_ref[...], preferred_element_type=jnp.float32) + bt_ref[...]
    )  # (GB, O)
    y = jnp.tanh(
        jnp.dot(img_ref[...], wi_ref[...], preferred_element_type=jnp.float32) + bi_ref[...]
    )  # (GB, O)

    # Row L2 normalization via rsqrt (EUP slot).
    # NOTE: no epsilon, matching torch `x / x.norm()` exactly (a zero row would NaN there too).
    u = u * lax.rsqrt(jnp.sum(u * u, axis=-1, keepdims=True))
    y = y * lax.rsqrt(jnp.sum(y * y, axis=-1, keepdims=True))

    # All pairwise similarities in one NT matmul (contract last dims -> no explicit y.T).
    # Off-block (cross-pair) entries are computed but masked out below; MXU rows are ~full.
    errors = lax.dot_general(
        u, y, dimension_numbers=(((1,), (1,)), ((), ())),
        preferred_element_type=jnp.float32,
    )  # (GB, GB)

    row = lax.broadcasted_iota(jnp.int32, (gb, gb), 0)
    col = lax.broadcasted_iota(jnp.int32, (gb, gb), 1)
    eye = row == col

    # Selector sel[r, p] = 1.0 iff row r belongs to pair p (built with iota compares only;
    # no vector integer division). Reused for the block mask and the per-pair reduction.
    r_idx = lax.broadcasted_iota(jnp.int32, (gb, pairs), 0)
    p_idx = lax.broadcasted_iota(jnp.int32, (gb, pairs), 1)
    sel = jnp.where(
        (r_idx >= p_idx * batch) & (r_idx < (p_idx + 1) * batch), 1.0, 0.0
    )  # (GB, G)

    # same_pair[r, c] = rows r and c belong to the same pair (tiny NT matmul; MXU is idle).
    same_pair = lax.dot_general(
        sel, sel, dimension_numbers=(((1,), (1,)), ((), ())),
        preferred_element_type=jnp.float32,
    ) > 0.5  # (GB, GB)

    # Diagonal similarities, broadcast along rows / columns.
    diag_masked = jnp.where(eye, errors, 0.0)
    diag_col = jnp.sum(diag_masked, axis=1, keepdims=True)   # (GB, 1)  lane reduce
    diag_row = jnp.sum(diag_masked, axis=0, keepdims=True)   # (1, GB)  sublane reduce (XLU slack)

    loss_s = jnp.maximum(margin - errors + diag_col, 0.0)
    loss_i = jnp.maximum(margin - errors + diag_row, 0.0)
    # Keep only same-pair, off-diagonal entries (zero diagonal + zero cross-pair blocks).
    loss_tot = jnp.where(same_pair & jnp.logical_not(eye), loss_s + loss_i, 0.0)  # (GB, GB)

    # Per-pair reduction: column sums, then a (1, GB)@(GB, G) matmul that segment-sums per
    # pair and lands the result lane-dense as (1, G) in one shot.
    col_sums = jnp.sum(loss_tot, axis=0, keepdims=True)      # (1, GB)
    per_pair = jnp.dot(col_sums, sel, preferred_element_type=jnp.float32)  # (1, G)

    # torch .mean() divides by B*B including the zeroed diagonal (intentional).
    loss_ref[...] = per_pair * (1.0 / float(batch * batch))


def vag_shared_space_decoder_batched(txt_stack, img_stack, params, *,
                                     margin: float = 0.1, target_rows: int = 128):
    """Evaluate P independent (txt, img) pairs, packing G pairs per grid step.

    txt_stack: (P, B, Dt) f32, img_stack: (P, B, Di) f32
    params: wt (Dt, O), bt (1, O), wi (Di, O), bi (1, O)
    Returns (P,) f32 per-pair losses.
    """
    P, B, Dt = txt_stack.shape
    Di = img_stack.shape[-1]
    O = params["wt"].shape[-1]

    # Pairs per grid step: fill ~target_rows MXU rows per projection matmul
    # (128 matches v5e's 128x128 MXU tiles; v6e/v7x are happy with it too).
    G = max(1, min(P, target_rows // max(B, 1)))
    S = -(-P // G)  # cdiv
    if S > 1 and S % 2 == 1:
        # v7x megacore balance: even step count so the "parallel" split is 50/50.
        # Costs one padded ~0.35us step on single-TC chips (v5e/v6e).
        S += 1
    P_pad = S * G
    if P_pad != P:
        pad = P_pad - P
        txt_stack = jnp.concatenate(
            [txt_stack, jnp.zeros((pad, B, Dt), txt_stack.dtype)], axis=0)
        img_stack = jnp.concatenate(
            [img_stack, jnp.zeros((pad, B, Di), img_stack.dtype)], axis=0)

    # Pure reshapes: (S, G*B, D) so every block's last two dims equal the full array dims
    # (unconditionally legal tiling, no (8,128) divisibility concerns for any B).
    txt_flat = txt_stack.reshape(S, G * B, Dt)
    img_flat = img_stack.reshape(S, G * B, Di)

    kernel = functools.partial(_vag_kernel, margin=float(margin), batch=B, pairs=G)
    losses = pl.pallas_call(
        kernel,
        out_shape=jax.ShapeDtypeStruct((S, 1, G), jnp.float32),
        grid=(S,),
        in_specs=[
            pl.BlockSpec((None, G * B, Dt), lambda s: (s, 0, 0)),  # txt contexts (per step)
            pl.BlockSpec((None, G * B, Di), lambda s: (s, 0, 0)),  # img contexts (per step)
            pl.BlockSpec((Dt, O), lambda s: (0, 0)),               # wt (shared)
            pl.BlockSpec((Di, O), lambda s: (0, 0)),               # wi (shared)
            pl.BlockSpec((1, O), lambda s: (0, 0)),                # bt (shared, bcast in-kernel)
            pl.BlockSpec((1, O), lambda s: (0, 0)),                # bi (shared, bcast in-kernel)
        ],
        out_specs=pl.BlockSpec((None, 1, G), lambda s: (s, 0, 0)),  # lane-dense loss row
        compiler_params=pltpu.CompilerParams(
            dimension_semantics=("parallel",)),                     # both TCs on v7x
    )(txt_flat, img_flat, params["wt"], params["wi"], params["bt"], params["bi"])
    return losses.reshape(P_pad)[:P]


def vag_shared_space_decoder(txt_ctx, img_ctx, params, *, margin: float = 0.1):
    """JAX/Pallas equivalent of VAGSharedSpaceDecoder.forward.

    txt_ctx: (1, B, txt_ctx_size) f32 ; img_ctx: (1, B, img_ctx_size) f32
    Returns {'loss': scalar f32}.
    """
    losses = vag_shared_space_decoder_batched(
        txt_ctx[0][None], img_ctx[0][None], params, margin=margin)
    return {"loss": losses[0]}


def _reference(txt, img, params, margin=0.1):
    """Pure-JAX reference mirroring the PyTorch forward (for validation)."""
    txt_out = jnp.tanh(txt @ params["wt"] + params["bt"])
    img_out = jnp.tanh(img @ params["wi"] + params["bi"])
    B = txt_out.shape[0]
    u = txt_out / jnp.linalg.norm(txt_out, axis=-1, keepdims=True)
    y = img_out / jnp.linalg.norm(img_out, axis=-1, keepdims=True)
    errors = u @ y.T
    diag = jnp.diag(errors)
    loss_s = jnp.maximum(margin - errors + diag[:, None], 0.0)
    loss_i = jnp.maximum(margin - errors + diag[None, :], 0.0)
    loss_tot = (loss_s + loss_i) * (1.0 - jnp.eye(B))
    return loss_tot.mean()


if __name__ == "__main__":
    # Small, module-consistent shapes.
    B = 8
    TXT_CTX, IMG_CTX, OUT = 32, 48, 64
    MARGIN = 0.1

    key = jax.random.PRNGKey(0)
    k_txt, k_img, k_wt, k_bt, k_wi, k_bi = jax.random.split(key, 6)

    txt_ctx = jax.random.normal(k_txt, (1, B, TXT_CTX), dtype=jnp.float32)
    img_ctx = jax.random.normal(k_img, (1, B, IMG_CTX), dtype=jnp.float32)

    # nn.Linear parameters stored transposed as (in, out).
    params = {
        "wt": 0.1 * jax.random.normal(k_wt, (TXT_CTX, OUT), dtype=jnp.float32),
        "bt": 0.1 * jax.random.normal(k_bt, (1, OUT), dtype=jnp.float32),
        "wi": 0.1 * jax.random.normal(k_wi, (IMG_CTX, OUT), dtype=jnp.float32),
        "bi": 0.1 * jax.random.normal(k_bi, (1, OUT), dtype=jnp.float32),
    }

    # --- single-pair forward (faithful to the PyTorch module interface) ---
    out = vag_shared_space_decoder(txt_ctx, img_ctx, params, margin=MARGIN)
    loss = jax.block_until_ready(out["loss"])
    ref = jax.block_until_ready(_reference(txt_ctx[0], img_ctx[0], params, MARGIN))
    assert jnp.allclose(loss, ref, atol=1e-4, rtol=1e-4), (loss, ref)

    # --- multi-pair forward, all pairs packed into ONE grid step (P=3 -> G=3, S=1) ---
    P1 = 3
    kt2, ki2 = jax.random.split(jax.random.PRNGKey(1), 2)
    txt_stack = jax.random.normal(kt2, (P1, B, TXT_CTX), dtype=jnp.float32)
    img_stack = jax.random.normal(ki2, (P1, B, IMG_CTX), dtype=jnp.float32)
    losses = jax.block_until_ready(
        vag_shared_space_decoder_batched(txt_stack, img_stack, params, margin=MARGIN))
    refs = jnp.stack([_reference(txt_stack[p], img_stack[p], params, MARGIN)
                      for p in range(P1)])
    assert jnp.allclose(losses, refs, atol=1e-4, rtol=1e-4), (losses, refs)

    # --- multi-pair, multi-step path (P=20 -> G=16 pairs/step, S=2, with pair padding) ---
    P2 = 20
    kt3, ki3 = jax.random.split(jax.random.PRNGKey(2), 2)
    txt_stack2 = jax.random.normal(kt3, (P2, B, TXT_CTX), dtype=jnp.float32)
    img_stack2 = jax.random.normal(ki3, (P2, B, IMG_CTX), dtype=jnp.float32)
    losses2 = jax.block_until_ready(
        vag_shared_space_decoder_batched(txt_stack2, img_stack2, params, margin=MARGIN))
    refs2 = jnp.stack([_reference(txt_stack2[p], img_stack2[p], params, MARGIN)
                       for p in range(P2)])
    assert jnp.allclose(losses2, refs2, atol=1e-4, rtol=1e-4), (losses2, refs2)

    print("KERNEL_OK")
</pallas_src>

<mosaic_0001>
module attributes {stable_mosaic.version = 11 : i64} {
  func.func @_vag_kernel(%arg0: i32, %arg1: memref<1x8x32xf32, #tpu.memory_space<vmem>>, %arg2: memref<1x8x48xf32, #tpu.memory_space<vmem>>, %arg3: memref<32x64xf32, #tpu.memory_space<vmem>>, %arg4: memref<48x64xf32, #tpu.memory_space<vmem>>, %arg5: memref<1x64xf32, #tpu.memory_space<vmem>>, %arg6: memref<1x64xf32, #tpu.memory_space<vmem>>, %arg7: memref<1x1x1xf32, #tpu.memory_space<vmem>>) attributes {dimension_semantics = [#tpu.dimension_semantics<parallel>], iteration_bounds = array<i64: 1>, scalar_prefetch = 0 : i64, scratch_operands = 0 : i64, tpu.core_type = #tpu.core_type<tc>, window_params = [{transform_indices = @transform_0, window_bounds = array<i64: 1, 8, 32>}, {transform_indices = @transform_1, window_bounds = array<i64: 1, 8, 48>}, {pipeline_mode = #tpu.pipeline_mode<synchronous>, transform_indices = @transform_2, window_bounds = array<i64: 32, 64>}, {pipeline_mode = #tpu.pipeline_mode<synchronous>, transform_indices = @transform_3, window_bounds = array<i64: 48, 64>}, {pipeline_mode = #tpu.pipeline_mode<synchronous>, transform_indices = @transform_4, window_bounds = array<i64: 1, 64>}, {pipeline_mode = #tpu.pipeline_mode<synchronous>, transform_indices = @transform_5, window_bounds = array<i64: 1, 64>}, {transform_indices = @transform_6, window_bounds = array<i64: 1, 1, 1>}]} {
    %c0 = arith.constant 0 : index
    %c0_0 = arith.constant 0 : index
    %c0_1 = arith.constant 0 : index
    %0 = vector.load %arg1[%c0, %c0_0, %c0_1] : memref<1x8x32xf32, #tpu.memory_space<vmem>>, vector<1x8x32xf32>
    %1 = vector.shape_cast %0 : vector<1x8x32xf32> to vector<8x32xf32>
    %c0_2 = arith.constant 0 : index
    %c0_3 = arith.constant 0 : index
    %2 = vector.load %arg3[%c0_2, %c0_3] : memref<32x64xf32, #tpu.memory_space<vmem>>, vector<32x64xf32>
    %cst = arith.constant dense<0.000000e+00> : vector<8x64xf32>
    %3 = tpu.matmul %1, %2, %cst {dimension_numbers = #tpu.dot_dimension_numbers<[1], [0], [0], [1], [0, 0, 1, 1], [], []>} : vector<8x32xf32>, vector<32x64xf32>, vector<8x64xf32> -> vector<8x64xf32>
    %c0_4 = arith.constant 0 : index
    %c0_5 = arith.constant 0 : index
    %4 = vector.load %arg5[%c0_4, %c0_5] : memref<1x64xf32, #tpu.memory_space<vmem>>, vector<1x64xf32>
    %5 = vector.broadcast %4 : vector<1x64xf32> to vector<8x64xf32>
    %6 = arith.addf %3, %5 : vector<8x64xf32>
    %7 = math.tanh %6 : vector<8x64xf32>
    %c0_6 = arith.constant 0 : index
    %c0_7 = arith.constant 0 : index
    %c0_8 = arith.constant 0 : index
    %8 = vector.load %arg2[%c0_6, %c0_7, %c0_8] : memref<1x8x48xf32, #tpu.memory_space<vmem>>, vector<1x8x48xf32>
    %9 = vector.shape_cast %8 : vector<1x8x48xf32> to vector<8x48xf32>
    %c0_9 = arith.constant 0 : index
    %c0_10 = arith.constant 0 : index
    %10 = vector.load %arg4[%c0_9, %c0_10] : memref<48x64xf32, #tpu.memory_space<vmem>>, vector<48x64xf32>
    %cst_11 = arith.constant dense<0.000000e+00> : vector<8x64xf32>
    %11 = tpu.matmul %9, %10, %cst_11 {dimension_numbers = #tpu.dot_dimension_numbers<[1], [0], [0], [1], [0, 0, 1, 1], [], []>} : vector<8x48xf32>, vector<48x64xf32>, vector<8x64xf32> -> vector<8x64xf32>
    %c0_12 = arith.constant 0 : index
    %c0_13 = arith.constant 0 : index
    %12 = vector.load %arg6[%c0_12, %c0_13] : memref<1x64xf32, #tpu.memory_space<vmem>>, vector<1x64xf32>
    %13 = vector.broadcast %12 : vector<1x64xf32> to vector<8x64xf32>
    %14 = arith.addf %11, %13 : vector<8x64xf32>
    %15 = math.tanh %14 : vector<8x64xf32>
    %16 = arith.mulf %7, %7 : vector<8x64xf32>
    %cst_14 = arith.constant dense<0.000000e+00> : vector<8xf32>
    %17 = vector.multi_reduction <add>, %16, %cst_14 [1] : vector<8x64xf32> to vector<8xf32>
    %18 = vector.shape_cast %17 : vector<8xf32> to vector<8x1xf32>
    %19 = math.rsqrt %18 : vector<8x1xf32>
    %20 = vector.broadcast %19 : vector<8x1xf32> to vector<8x64xf32>
    %21 = arith.mulf %7, %20 : vector<8x64xf32>
    %22 = arith.mulf %15, %15 : vector<8x64xf32>
    %cst_15 = arith.constant dense<0.000000e+00> : vector<8xf32>
    %23 = vector.multi_reduction <add>, %22, %cst_15 [1] : vector<8x64xf32> to vector<8xf32>
    %24 = vector.shape_cast %23 : vector<8xf32> to vector<8x1xf32>
    %25 = math.rsqrt %24 : vector<8x1xf32>
    %26 = vector.broadcast %25 : vector<8x1xf32> to vector<8x64xf32>
    %27 = arith.mulf %15, %26 : vector<8x64xf32>
    %cst_16 = arith.constant dense<0.000000e+00> : vector<8x8xf32>
    %28 = tpu.matmul %21, %27, %cst_16 {dimension_numbers = #tpu.dot_dimension_numbers<[1], [1], [0], [0], [0, 0, 1, 0], [], []>} : vector<8x64xf32>, vector<8x64xf32>, vector<8x8xf32> -> vector<8x8xf32>
    %29 = tpu.iota {dimensions = array<i32: 0>} : vector<8x8xi32>
    %30 = tpu.iota {dimensions = array<i32: 1>} : vector<8x8xi32>
    %31 = arith.cmpi eq, %29, %30 : vector<8x8xi32>
    %32 = tpu.iota {dimensions = array<i32: 0>} : vector<8x1xi32>
    %33 = tpu.iota {dimensions = array<i32: 1>} : vector<8x1xi32>
    %c8_i32 = arith.constant 8 : i32
    %34 = vector.broadcast %c8_i32 : i32 to vector<8x1xi32>
    %35 = arith.muli %33, %34 : vector<8x1xi32>
    %36 = arith.cmpi sge, %32, %35 : vector<8x1xi32>
    %c1_i32 = arith.constant 1 : i32
    %37 = vector.broadcast %c1_i32 : i32 to vector<8x1xi32>
    %38 = arith.addi %33, %37 : vector<8x1xi32>
    %c8_i32_17 = arith.constant 8 : i32
    %39 = vector.broadcast %c8_i32_17 : i32 to vector<8x1xi32>
    %40 = arith.muli %38, %39 : vector<8x1xi32>
    %41 = arith.cmpi slt, %32, %40 : vector<8x1xi32>
    %42 = arith.andi %36, %41 : vector<8x1xi1>
    %cst_18 = arith.constant 1.000000e+00 : f32
    %cst_19 = arith.constant 0.000000e+00 : f32
    %43 = vector.broadcast %cst_18 : f32 to vector<8x1xf32>
    %44 = vector.broadcast %cst_19 : f32 to vector<8x1xf32>
    %45 = arith.select %42, %43, %44 : vector<8x1xi1>, vector<8x1xf32>
    %cst_20 = arith.constant dense<0.000000e+00> : vector<8x8xf32>
    %46 = tpu.matmul %45, %45, %cst_20 {dimension_numbers = #tpu.dot_dimension_numbers<[1], [1], [0], [0], [0, 0, 1, 0], [], []>} : vector<8x1xf32>, vector<8x1xf32>, vector<8x8xf32> -> vector<8x8xf32>
    %cst_21 = arith.constant 5.000000e-01 : f32
    %47 = vector.broadcast %cst_21 : f32 to vector<8x8xf32>
    %48 = arith.cmpf ogt, %46, %47 : vector<8x8xf32>
    %cst_22 = arith.constant 0.000000e+00 : f32
    %49 = vector.broadcast %cst_22 : f32 to vector<8x8xf32>
    %50 = arith.select %31, %28, %49 : vector<8x8xi1>, vector<8x8xf32>
    %cst_23 = arith.constant dense<0.000000e+00> : vector<8xf32>
    %51 = vector.multi_reduction <add>, %50, %cst_23 [1] : vector<8x8xf32> to vector<8xf32>
    %52 = vector.shape_cast %51 : vector<8xf32> to vector<8x1xf32>
    %cst_24 = arith.constant dense<0.000000e+00> : vector<8xf32>
    %53 = vector.multi_reduction <add>, %50, %cst_24 [0] : vector<8x8xf32> to vector<8xf32>
    %54 = vector.shape_cast %53 : vector<8xf32> to vector<1x8xf32>
    %cst_25 = arith.constant 1.000000e-01 : f32
    %55 = vector.broadcast %cst_25 : f32 to vector<8x8xf32>
    %56 = arith.subf %55, %28 : vector<8x8xf32>
    %57 = vector.broadcast %52 : vector<8x1xf32> to vector<8x8xf32>
    %58 = arith.addf %56, %57 : vector<8x8xf32>
    %cst_26 = arith.constant 0.000000e+00 : f32
    %59 = vector.broadcast %cst_26 : f32 to vector<8x8xf32>
    %60 = arith.maximumf %58, %59 : vector<8x8xf32>
    %cst_27 = arith.constant 1.000000e-01 : f32
    %61 = vector.broadcast %cst_27 : f32 to vector<8x8xf32>
    %62 = arith.subf %61, %28 : vector<8x8xf32>
    %63 = vector.broadcast %54 : vector<1x8xf32> to vector<8x8xf32>
    %64 = arith.addf %62, %63 : vector<8x8xf32>
    %cst_28 = arith.constant 0.000000e+00 : f32
    %65 = vector.broadcast %cst_28 : f32 to vector<8x8xf32>
    %66 = arith.maximumf %64, %65 : vector<8x8xf32>
    %cst_29 = arith.constant dense<true> : vector<8x8xi1>
    %67 = arith.xori %31, %cst_29 : vector<8x8xi1>
    %68 = arith.andi %48, %67 : vector<8x8xi1>
    %69 = arith.addf %60, %66 : vector<8x8xf32>
    %cst_30 = arith.constant 0.000000e+00 : f32
    %70 = vector.broadcast %cst_30 : f32 to vector<8x8xf32>
    %71 = arith.select %68, %69, %70 : vector<8x8xi1>, vector<8x8xf32>
    %cst_31 = arith.constant dense<0.000000e+00> : vector<8xf32>
    %72 = vector.multi_reduction <add>, %71, %cst_31 [0] : vector<8x8xf32> to vector<8xf32>
    %73 = vector.shape_cast %72 : vector<8xf32> to vector<1x8xf32>
    %cst_32 = arith.constant dense<0.000000e+00> : vector<1x1xf32>
    %74 = tpu.matmul %73, %45, %cst_32 {dimension_numbers = #tpu.dot_dimension_numbers<[1], [0], [0], [1], [0, 0, 1, 1], [], []>} : vector<1x8xf32>, vector<8x1xf32>, vector<1x1xf32> -> vector<1x1xf32>
    %cst_33 = arith.constant 1.562500e-02 : f32
    %75 = vector.broadcast %cst_33 : f32 to vector<1x1xf32>
    %76 = arith.mulf %74, %75 : vector<1x1xf32>
    %c0_34 = arith.constant 0 : index
    %c0_35 = arith.constant 0 : index
    %c0_36 = arith.constant 0 : index
    %77 = vector.load %arg7[%c0_34, %c0_35, %c0_36] : memref<1x1x1xf32, #tpu.memory_space<vmem>>, vector<1x1x1xf32>
    %78 = vector.shape_cast %77 : vector<1x1x1xf32> to vector<1x1xf32>
    %79 = vector.shape_cast %76 : vector<1x1xf32> to vector<1x1x1xf32>
    tpu.vector_store %arg7[%c0_34, %c0_35, %c0_36], %79 {strides = array<i32>} : memref<1x1x1xf32, #tpu.memory_space<vmem>>, vector<1x1x1xf32>,
    return
  }
  func.func @transform_0(%arg0: i32) -> (i32, i32, i32) {
    %c0_i32 = arith.constant 0 : i32
    %c0_i32_0 = arith.constant 0 : i32
    %c0_i32_1 = arith.constant 0 : i32
    return %arg0, %c0_i32, %c0_i32_0 : i32, i32, i32
  }
  func.func @transform_1(%arg0: i32) -> (i32, i32, i32) {
    %c0_i32 = arith.constant 0 : i32
    %c0_i32_0 = arith.constant 0 : i32
    %c0_i32_1 = arith.constant 0 : i32
    return %arg0, %c0_i32, %c0_i32_0 : i32, i32, i32
  }
  func.func @transform_2(%arg0: i32) -> (i32, i32) {
    %c0_i32 = arith.constant 0 : i32
    %c0_i32_0 = arith.constant 0 : i32
    %c0_i32_1 = arith.constant 0 : i32
    return %c0_i32, %c0_i32_0 : i32, i32
  }
  func.func @transform_3(%arg0: i32) -> (i32, i32) {
    %c0_i32 = arith.constant 0 : i32
    %c0_i32_0 = arith.constant 0 : i32
    %c0_i32_1 = arith.constant 0 : i32
    return %c0_i32, %c0_i32_0 : i32, i32
  }
  func.func @transform_4(%arg0: i32) -> (i32, i32) {
    %c0_i32 = arith.constant 0 : i32
    %c0_i32_0 = arith.constant 0 : i32
    %c0_i32_1 = arith.constant 0 : i32
    return %c0_i32, %c0_i32_0 : i32, i32
  }
  func.func @transform_5(%arg0: i32) -> (i32, i32) {
    %c0_i32 = arith.constant 0 : i32
    %c0_i32_0 = arith.constant 0 : i32
    %c0_i32_1 = arith.constant 0 : i32
    return %c0_i32, %c0_i32_0 : i32, i32
  }
  func.func @transform_6(%arg0: i32) -> (i32, i32, i32) {
    %c0_i32 = arith.constant 0 : i32
    %c0_i32_0 = arith.constant 0 : i32
    %c0_i32_1 = arith.constant 0 : i32
    return %arg0, %c0_i32, %c0_i32_0 : i32, i32, i32
  }
}

</mosaic_0001>

<bundles_post_ra>
// kernel: tpu_custom_call.1
= control target key start
LH: loop header
LB: loop body
LE: loop exit
PB: predicated region body
PF: predicated region fallthrough
CT: control target
= control target key end

     0   :  { %11 = vsyncpa [#allocation3], 0  ;;  %s865_s0 = inlined_call_operand.hbm [shape: f32[1,8,32], index: 0, kind: input, shape index: {}]   ;;  %s866_s1 = inlined_call_operand.hbm [shape: f32[1,8,48], index: 1, kind: input, shape index: {}]   ;;  %s867_s2 = inlined_call_operand.hbm [shape: f32[32,64], index: 2, kind: input, shape index: {}]   ;;  %s868_s3 = inlined_call_operand.hbm [shape: f32[48,64], index: 3, kind: input, shape index: {}]   ;;  %s869_s4 = inlined_call_operand.vmem [shape: f32[1,64], index: 4, kind: input, shape index: {}]   ;;  %s870_s5 = inlined_call_operand.vmem [shape: f32[1,64], index: 5, kind: input, shape index: {}]   ;;  %s871_s6 = inlined_call_operand.hbm [shape: f32[1,1,1], index: 6, kind: output, shape index: {}]  }
   0x1   :  { %12 = vsyncpa [#allocation6], 0 }
   0x2   :  { %13 = vsyncpa [#allocation9], 0 }
   0x3   :  { %14 = vsyncpa [#allocation4], 0  ;;  %s743_s21 = smov [#allocation5]   ;;  %s744_s23 = smov [#allocation2]  }
   0x4   :  { %s31_s22 = sshll.u32 %s743_s21, 4  ;;  %s21_s24 = sshll.u32 %s744_s23, 4  ;;  %s32_s22 = int_to_ptr.vmem [resolvable:$true] %s31_s22  ;;  %s22_s24 = int_to_ptr.vmem [resolvable:$true] %s21_s24 }
   0x5   :  { %s643_s25 = scalar_lea.vmem %s32_s22, 128  ;;  %p648_p1 = scmp.lt.s32.totalorder %s32_s22, %s32_s22 }
   0x6   :  { %p644_p0 = scmp.ne.s32.totalorder %s32_s22, %s643_s25  ;;  %p649_p2 = scmp.lt.s32.totalorder %s643_s25, %s643_s25 }
   0x8   :  { %p650_p3 = por %p649_p2, %p648_p1 }
   0xa   :  { %p651_p4 = pnand %p650_p3, %p644_p0 }
   0xc   :  { %654 = shalt.err (!%p651_p4)
}
   0xd   :  { %34 = dma.hbm_to_vmem [thread:$0]  %s866_s1, 128, %s32_s22, [#allocation6]  }
   0xe   :  { %s663_s28 = scalar_lea.vmem %s22_s24, 128  ;;  %p668_p6 = scmp.lt.s32.totalorder %s22_s24, %s22_s24 }
   0xf   :  { %p664_p5 = scmp.ne.s32.totalorder %s22_s24, %s663_s28  ;;  %p669_p7 = scmp.lt.s32.totalorder %s663_s28, %s663_s28 }
  0x11   :  { %p670_p8 = por %p669_p7, %p668_p6 }
  0x13   :  { %p671_p9 = pnand %p670_p8, %p664_p5 }
  0x15   :  { %674 = shalt.err (!%p671_p9)
}
  0x16   :  { %24 = dma.hbm_to_vmem [thread:$0]  %s865_s0, 128, %s22_s24, [#allocation3]  }
  0x17   :  { %s745_s7 = smov [#allocation7]  }
  0x18   :  { %s40_s8 = sshll.u32 %s745_s7, 4  ;;  %s41_s8 = int_to_ptr.vmem [resolvable:$true] %s40_s8 }
  0x19   :  { %s683_s9 = scalar_lea.vmem %s41_s8, 512  ;;  %p688_p11 = scmp.lt.s32.totalorder %s41_s8, %s41_s8 }
  0x1a   :  { %p684_p10 = scmp.ne.s32.totalorder %s41_s8, %s683_s9  ;;  %p689_p12 = scmp.lt.s32.totalorder %s683_s9, %s683_s9 }
  0x1c   :  { %p690_p13 = por %p689_p12, %p688_p11 }
  0x1e   :  { %p691_p0 = pnand %p690_p13, %p684_p10 }
  0x20   :  { %694 = shalt.err (!%p691_p0)
}
  0x21   :  { %s746_s1 = smov 128   ;;  %s747_s10 = smov 8  }
  0x22   :  { %46 = dma.hbm_to_vmem [thread:$0]  %s867_s2, 512, %s41_s8, [#allocation6], %s746_s1, %s746_s1, %s747_s10  }
  0x23   :  { %s748_s13 = smov [#allocation8]  }
  0x24   :  { %s52_s14 = sshll.u32 %s748_s13, 4  ;;  %s53_s14 = int_to_ptr.vmem [resolvable:$true] %s52_s14 }
  0x25   :  { %s703_s0 = scalar_lea.vmem %s53_s14, 768  ;;  %p708_p2 = scmp.lt.s32.totalorder %s53_s14, %s53_s14 }
  0x26   :  { %p704_p1 = scmp.ne.s32.totalorder %s53_s14, %s703_s0  ;;  %p709_p3 = scmp.lt.s32.totalorder %s703_s0, %s703_s0 }
  0x28   :  { %p710_p4 = por %p709_p3, %p708_p2 }
  0x2a   :  { %p711_p5 = pnand %p710_p4, %p704_p1 }
  0x2c   :  { %714 = shalt.err (!%p711_p5)
}
  0x2d   :  { %58 = dma.hbm_to_vmem [thread:$0]  %s868_s3, 768, %s53_s14, [#allocation9], %s746_s1, %s746_s1, %s747_s10  }
  0x2e   :  { %735 = dma.done.wait [#allocation3], 128  }
  0x2f   :  { %736 = vsyncadd [#allocation3], 4294967168 }
  0x30   :  { %737 = dma.done.wait [#allocation6], 640  }
  0x31   :  { %738 = vsyncadd [#allocation6], 4294966656 }
  0x32   :  { %739 = dma.done.wait [#allocation9], 768  }
  0x33   :  { %740 = vsyncadd [#allocation9], 4294966528  ;;  %v749_v0 = vmov 0.0   ;;  %vm750_vm0 = vmmov 0   ;;  %v168_v1 = vld [vmem:[#allocation8 + $0x28] sm:$0xff]  ;;  %v167_v2 = vld [vmem:[#allocation8 + $0x20] sm:$0xff]  ;;  %v340_v27 = vlaneseq }
  0x34   :  { %586 = vmatprep.subr.mxu1 %v749_v0  ;;  %575 = vmatprep.subr.mxu0 %v749_v0  ;;  %v79_v3 = vld [vmem:[#allocation7 + $0x18] sm:$0xff]  ;;  %v78_v4 = vld [vmem:[#allocation7 + $0x10] sm:$0xff]  ;;  %v77_v6 = vld [vmem:[#allocation7 + $0x8] sm:$0xff]  ;;  %vm87_vm1 = vcmask 261120   ;;  %vm176_vm2 = vcmask 392192   ;;  %vm252_vm3 = vcmask 523264  }
  0x35   :  { %598 = vmatprep.mubr.msk.f32.mxu1 %vm750_vm0, %v749_v0  ;;  %583 = vmatprep.mubr.msk.f32.mxu0 %vm750_vm0, %v749_v0  ;;  %v166_v5 = vld [vmem:[#allocation8 + $0x18] sm:$0xff]  ;;  %v165_v7 = vld [vmem:[#allocation8 + $0x10] sm:$0xff]  ;;  %v76_v8 = vld [vmem:[#allocation7] sm:$0xff]  ;;  %v343_v29 = vand.u32 127, %v340_v27  ;;  %v341_v32 = vshrl.u32 %v340_v27, 7  ;;  %vm352_vm7 = vcmask 7168  }
  0x36   :  { %587 = vmatpush3.msra.mxu1 %v168_v1  ;;  %576 = vmatpush3.msra.mxu0 %v79_v3  ;;  %v164_v9 = vld [vmem:[#allocation8 + $0x8] sm:$0xff]  ;;  %v75_v10 = vld [vmem:[#allocation2] sm:$0xff]  ;;  %v163_v11 = vld [vmem:[#allocation8] sm:$0xff]  ;;  %vm428_vm9 = vcmask 64512   ;;  %vm751_vm11 = vmmov 1   ;;  %v752_v56 = vmov 1.0  }
  0x37   :  { %588 = vmatprep.subr.mxu1 %v749_v0  ;;  %577 = vmatprep.subr.mxu0 %v749_v0  ;;  %v162_v12 = vld [vmem:[#allocation5] sm:$0xff]  ;;  %v547_v13 = vld [vmem:[%s869_s4] ss:$0 sm:$0xff]  ;;  %v347_v31 = vadd.s32 1, %v343_v29  ;;  %v345_v33 = vmul.u32 8, %v343_v29  ;;  %vm344_vm8 = vcmp.eq.s32.totalorder %v341_v32, %v343_v29  ;;  %s753_s4 = smov [#allocation10]  }
  0x38   :  { %589 = vmatpush3.msra.mxu1 %v167_v2  ;;  %578 = vmatpush3.msra.mxu0 %v78_v4  ;;  %v549_v15 = vld [vmem:[%s870_s5] ss:$0 sm:$0xff]  ;;  %vm443_vm12 = vmxor %vm344_vm8, %vm751_vm11  ;;  %s536_s5 = sshll.u32 %s753_s4, 4  ;;  %vm528_vm14 = vcmask 0   ;;  %s537_s5 = int_to_ptr.vmem [resolvable:$true] %s536_s5 }
  0x39   :  { %590 = vmatprep.subr.mxu1 %v749_v0  ;;  %579 = vmatprep.subr.mxu0 %v749_v0  ;;  %v348_v34 = vmul.u32 8, %v347_v31  ;;  %vm829_vm4 = vcmp.ge.s32.totalorder %v341_v32, %v345_v33  ;;  %s715_s19 = scalar_lea.vmem %s537_s5, 16  ;;  %s719_s20 = scalar_lea.vmem %s537_s5, 32 }
  0x3a   :  { %591 = vmatpush3.msra.mxu1 %v166_v5  ;;  %580 = vmatpush3.msra.mxu0 %v77_v6  ;;  %p716_p6 = scmp.ne.s32.totalorder %s537_s5, %s715_s19  ;;  %p720_p7 = scmp.lt.s32.totalorder %s537_s5, %s537_s5 }
  0x3b   :  { %592 = vmatprep.subr.mxu1 %v749_v0  ;;  %581 = vmatprep.subr.mxu0 %v749_v0  ;;  %vm833_vm5 = vcmp.lt.s32.totalorder %v341_v32, %v348_v34  ;;  %p721_p8 = scmp.lt.s32.totalorder %s719_s20, %s715_s19 }
  0x3c   :  { %593 = vmatpush3.msra.mxu1 %v165_v7  ;;  %582 = vmatpush3.msra.mxu0 %v76_v8  ;;  %vm350_vm6 = vmand %vm829_vm4, %vm833_vm5 }
  0x3d   :  { %594 = vmatprep.subr.mxu1 %v749_v0  ;;  %584 = vmatmul.mubr.msk.f32.vlgmr.msra.gmra.mxu0 %vm87_vm1, %v75_v10  ;;  %v351_v41 = vsel %vm350_vm6, 1.0, %v749_v0  ;;  %p722_p9 = por %p721_p8, %p720_p7 }
  0x3e   :  { %595 = vmatpush3.msra.mxu1 %v164_v9  ;;  %601 = vmatprep.subr.mxu0 %v749_v0 }
  0x3f   :  { %596 = vmatprep.subr.mxu1 %v749_v0  ;;  %603 = vmatprep.mubr.msk.f32.mxu0 %vm750_vm0, %v749_v0  ;;  %p723_p10 = pnand %p722_p9, %p716_p6 }
  0x40   :  { %597 = vmatpush3.msra.mxu1 %v163_v11 }
  0x41   :  { %599 = vmatmul.mubr.msk.f32.vlgmr.msra.gmra.mxu1 %vm176_vm2, %v162_v12  ;;  %611 = vmatprep.subr.mxu1 %v749_v0 }
  0x42   :  { %613 = vmatprep.mubr.msk.f32.mxu1 %vm750_vm0, %v749_v0  ;;  %612 = vmatpush3.msk.msra.mxu1 %vm350_vm6, %v752_v56 }
  0xfd   :  { %v157_v14 = vpop.f32.mrf.mxu0 }
  0xfe   :  { %v158_v16 = vadd.f32 %v547_v13, %v157_v14 }
  0xff   :  { %v585_v17 = vpop.f32.mrf.mxu0 }
 0x100   :  { %627 = vtanh.f32 %v158_v16 }
 0x101   :  { %v246_v18 = vpop.f32.mrf.mxu1 }
 0x102   :  { %v247_v19 = vadd.f32 %v549_v15, %v246_v18 }
 0x103   :  { %v600_v20 = vpop.f32.mrf.mxu1 }
 0x104   :  { %629 = vtanh.f32 %v247_v19 }
 0x10d   :  { %v628_v21 = vpop.eup %627 }
 0x10e   :  { %v251_v24 = vmul.f32 %v628_v21, %v628_v21 }
 0x110   :  { %v253_v26 = vsel %vm252_vm3, %v251_v24, 0.0 }
 0x111   :  { %v630_v22 = vpop.eup %629 }
 0x112   :  { %v258_v23 = vmul.f32 %v630_v22, %v630_v22 }
 0x114   :  { %v259_v25 = vsel %vm252_vm3, %v258_v23, 0.0 }
 0x115   :  { %260 = vadd.xlane.f32.xlu0 %v259_v25 }
 0x119   :  { %254 = vadd.xlane.f32.xlu0 %v253_v26 }
 0x19e   :  { %v261_v28 = vpop.xlane.xlu0 %260 }
 0x19f   :  { %631 = vrsqrt.f32 %v261_v28 }
 0x1a2   :  { %v255_v30 = vpop.xlane.xlu0 %254 }
 0x1a3   :  { %633 = vrsqrt.f32 %v255_v30 }
 0x1ac   :  { %v632_v37 = vpop.eup %631 }
 0x1ad   :  { %v263_v38 = vmul.f32 %v632_v37, %v630_v22 }
 0x1af   :  { %602 = vmatpush3.xpose.msk.msra.mxu0 %vm252_vm3, %v263_v38 }
 0x1b0   :  { %v634_v39 = vpop.eup %633  ;;  %606 = vmatprep.subr.mxu0 %v749_v0 }
 0x1b1   :  { %v257_v40 = vmul.f32 %v634_v39, %v628_v21 }
 0x1b3   :  { %604 = vmatmul.mubr.msk.f32.vlgmr.msra.gmra.mxu0 %vm252_vm3, %v257_v40 }
 0x1b4   :  { %607 = vmatpush3.xpose.msk.msra.mxu0 %vm352_vm7, %v351_v41  ;;  %608 = vmatprep.mubr.msk.f32.mxu0 %vm750_vm0, %v749_v0 }
 0x1b7   :  { %609 = vmatmul.mubr.msk.f32.vlgmr.msra.gmra.mxu0 %vm352_vm7, %v351_v41 }
 0x273   :  { %v336_v42 = vpop.f32.mrf.mxu0 }
 0x274   :  { %v427_v43 = vsel %vm344_vm8, %v336_v42, 0.0  ;;  %v438_v51 = vsub.f32 0.1, %v336_v42 }
 0x275   :  { %v605_v44 = vpop.f32.mrf.mxu0  ;;  %v429_v45 = vsel %vm428_vm9, %v427_v43, 0.0 }
 0x276   :  { %430 = vadd.xlane.f32.xlu1 %v429_v45  ;;  %v432_v46 = vrot.slane %v429_v45, 4 }
 0x277   :  { %v422_v53 = vpop.f32.mrf.mxu0 }
 0x278   :  { %v433_v47 = vadd.f32 %v432_v46, %v429_v45  ;;  %vm426_vm10 = vcmp.gt.f32.partialorder %v422_v53, 0.5 }
 0x279   :  { %v610_v55 = vpop.f32.mrf.mxu0  ;;  %vm444_vm13 = vmand %vm426_vm10, %vm443_vm12 }
 0x27a   :  { %v434_v48 = vrot.slane %v433_v47, 2 }
 0x27c   :  { %v435_v49 = vadd.f32 %v434_v48, %v433_v47 }
 0x27e   :  { %v436_v50 = vrot.slane %v435_v49, 1 }
 0x280   :  { %v437_v52 = vadd.f32 %v436_v50, %v435_v49 }
 0x282   :  { %v441_v54 = vadd.f32 %v438_v51, %v437_v52 }
 0x284   :  { %v442_v60 = vmax.f32 %v441_v54, 0.0 }
 0x2ff   :  { %v431_v57 = vpop.xlane.xlu1 %430 }
 0x300   :  { %v439_v58 = vadd.f32 %v438_v51, %v431_v57 }
 0x302   :  { %v440_v59 = vmax.f32 %v439_v58, 0.0 }
 0x304   :  { %v445_v61 = vadd.f32 %v442_v60, %v440_v59 }
 0x306   :  { %v446_v62 = vsel %vm444_vm13, %v445_v61, 0.0 }
 0x307   :  { %v447_v63 = vsel %vm428_vm9, %v446_v62, 0.0 }
 0x308   :  { %v448_v0 = vrot.slane %v447_v63, 4 }
 0x30a   :  { %v449_v1 = vadd.f32 %v448_v0, %v447_v63 }
 0x30c   :  { %v450_v2 = vrot.slane %v449_v1, 2 }
 0x30e   :  { %v451_v3 = vadd.f32 %v450_v2, %v449_v1 }
 0x310   :  { %v452_v4 = vrot.slane %v451_v3, 1 }
 0x312   :  { %v453_v5 = vadd.f32 %v452_v4, %v451_v3 }
 0x314   :  { %614 = vmatmul.mubr.msk.f32.vlgmr.msra.gmra.mxu1 %vm428_vm9, %v453_v5 }
 0x3d4   :  { %v523_v6 = vpop.f32.mrf.mxu1 }
 0x3d5   :  { %v527_v7 = vmul.f32 0.015625, %v523_v6 }
 0x3d6   :  { %v615_v8 = vpop.f32.mrf.mxu1 }
 0x3d7   :  { %529 = vst.msk [vmem:[#allocation10] sm:$0x1] %vm528_vm14, %v527_v7 }
 0x3d8   :  { %726 = shalt.err (!%p723_p10)
}
 0x3d9   :  { %539 = dma.vmem_to_hbm [thread:$0]  %s537_s5, 16, %s871_s6, [#allocation4]  }
 0x3da   :  { %741 = dma.done.wait [#allocation4], 16  }
 0x3db   :  { %742 = vsyncadd [#allocation4], 4294967280 }
 0x3dc   :  { %543 = vsyncpa [#allocation3], 1 }
 0x3dd   :  { %544 = vsyncpa [#allocation6], 1 }
 0x3de   :  { %545 = vsyncpa [#allocation9], 1 }
 0x3df   :  { %546 = vsyncpa [#allocation4], 1 }

</bundles_post_ra>
